<compile_context>
chip_gen: v6e
topology: v6e:2x2x1
jax: 0.10.0
libtpu: 0.0.40
codegen_flags: <defaults>
</compile_context>

<pallas_src>
import functools

import jax
import jax.numpy as jnp
from jax import lax
from jax.experimental import pallas as pl
from jax.experimental.pallas import tpu as pltpu

LEAKY_ALPHA = 0.2  # GraphAttentionLayer(alpha=0.2)


def news_encoder_kernel(tid_ref, emb_ext_ref, W_ref, Wa_ref, ba_ref, qv_ref,
                        out_ref, *, batch, seq, embed_dim):
    N = tid_ref.shape[0]          # batch * seq  (sublane axis)
    V = emb_ext_ref.shape[0]      # vocabulary size
    E = embed_dim
    cdt = emb_ext_ref.dtype       # MXU operand dtype (f32 or bf16); accum is f32

    # ---- fused embedding gather + GAT logit lookup: oh @ [emb | emb@W@a1 | emb@W@a2]
    # TODO(synk): for a large vocabulary replace the one-hot matmul with a DMA row
    # gather (PrefetchScalarGridSpec + make_async_copy); this form is O(N*V*E).
    iota_nv = lax.broadcasted_iota(jnp.int32, (N, V), 1)
    oh = jnp.where(iota_nv == tid_ref[...], 1.0, 0.0).astype(cdt)        # (N, V)
    x_ext = jnp.dot(oh, emb_ext_ref[...],
                    preferred_element_type=jnp.float32)                  # (N, E+2)
    wh1 = x_ext[:, E:E + 1]                                              # (N, 1) = Wh@a1
    wh2_col = x_ext[:, E + 1:E + 2]                                      # (N, 1) = Wh@a2

    # (N,1) -> (1,N) relayout via identity mask + sublane reduce (VPU/XLU only).
    rows = lax.broadcasted_iota(jnp.int32, (N, N), 0)
    cols = lax.broadcasted_iota(jnp.int32, (N, N), 1)
    wh2_row = jnp.sum(jnp.where(rows == cols, wh2_col, 0.0),
                      axis=0, keepdims=True)                             # (1, N)

    # ---- GraphAttentionLayer (adj == all-ones over the N = B*S flattened tokens) ----
    # TODO(synk): at large B*S, tile rows on a parallel grid axis (2 TCs on v7x) and
    # run an online softmax over column tiles so the NxN buffers fit VMEM (v7x: 64 MiB).
    e = wh1 + wh2_row                                                    # (N, N)
    e = jnp.where(e > 0, e, LEAKY_ALPHA * e)                             # LeakyReLU(0.2)
    m = jnp.max(e, axis=1, keepdims=True)
    p = jnp.exp(e - m)
    att = p * pl.reciprocal(jnp.sum(p, axis=1, keepdims=True), approx=True)

    # W zero-padded with 2 rows in the wrapper -> x_ext @ W_pad == x @ W exactly.
    Wh = jnp.dot(x_ext.astype(cdt), W_ref[...],
                 preferred_element_type=jnp.float32)                     # (N, E)
    h_prime = jnp.dot(att.astype(cdt), Wh.astype(cdt),
                      preferred_element_type=jnp.float32)                # (N, E)
    # ELU(alpha=1): x for x>0, exp(x)-1 otherwise (clamp exp arg for safety).
    gat = jnp.where(h_prime > 0, h_prime,
                    jnp.exp(jnp.minimum(h_prime, 0.0)) - 1.0)            # (N, E)

    # ---- AdditiveAttention over the seq axis, vectorized over the batch ----
    temp = jnp.tanh(jnp.dot(gat.astype(cdt), Wa_ref[...],
                            preferred_element_type=jnp.float32)
                    + ba_ref[...])                                       # (N, Q)
    Q = temp.shape[1]
    # NOTE: seq == 8 keeps these (N,*) -> (B,S,*) reshapes copy-free (f32 sublane
    # pack); a non-multiple-of-8 seq would force a VMEM re-layout copy.
    g3 = gat.reshape(batch, seq, E)
    t3 = temp.reshape(batch, seq, Q)
    # scores / softmax kept in (B, S, 1) column layout: lane reduce, then sublane
    # group reduces over the seq axis — no lane<->sublane relayout, MXU untouched.
    scores = jnp.sum(t3 * qv_ref[...], axis=-1, keepdims=True)           # (B, S, 1)
    sm = jnp.max(scores, axis=1, keepdims=True)                          # (B, 1, 1)
    w = jnp.exp(scores - sm)
    w = w * pl.reciprocal(jnp.sum(w, axis=1, keepdims=True), approx=True)
    # VPU weighted sum over seq (broadcast multiply + sublane-group reduce).
    # TODO(synk): at larger batch, pack 4 titles per 128-lane row (lane-dense output
    # slab) in the wrapper to avoid masked partial stores of the E=32-wide output.
    out_ref[...] = jnp.sum(w * g3, axis=1)                               # (B, E)


def news_encoder(title, embedding, W, a, Wa, ba, qv, *, mxu_dtype=jnp.float32):
    """title: (B, S) int32 token ids. Returns (B, E) float32 news vectors.

    mxu_dtype=jnp.bfloat16 casts MXU operands on the wrapper side (f32
    accumulation, f32 elementwise/EUP math) — valid on v5e/v6e/v7x; the default
    keeps everything f32 for exact module semantics.
    """
    B, S = title.shape
    V, E = embedding.shape
    N = B * S
    Q = Wa.shape[1]
    f32 = jnp.float32

    embedding = embedding.astype(f32)
    # Parameter-only folding (once per model, not per token):
    # Wh @ a1 = x @ (W @ a1) = onehot(title) @ (emb @ W @ a1), same for a2.
    # Fold both per-vocab logit columns into the gather table.
    ew1 = embedding @ (W @ a[:E, :])                       # (V, 1)
    ew2 = embedding @ (W @ a[E:, :])                       # (V, 1)
    emb_ext = jnp.concatenate([embedding, ew1, ew2], axis=1)          # (V, E+2)
    # Two zero rows so x_ext @ W_pad == x @ W without slicing x_ext in-kernel.
    W_pad = jnp.concatenate([W.astype(f32), jnp.zeros((2, E), f32)], axis=0)

    # Wrapper-side operand casts (bf16 mode halves weight/table DMA bytes and
    # removes in-kernel weight casts; no-op in f32 mode).
    emb_ext = emb_ext.astype(mxu_dtype)
    W_pad = W_pad.astype(mxu_dtype)
    Wa_c = Wa.astype(mxu_dtype)

    tid_col = title.reshape(N, 1).astype(jnp.int32)
    ba2d = ba.reshape(1, Q).astype(f32)
    qv_row = qv.reshape(1, Q).astype(f32)

    # Dropout is inference-mode (identity).
    # TODO(synk): training-mode dropout (p=config.dropout_probability) not modeled.
    # TODO(synk): to amortize dispatch at many titles, batch them into one call with
    # a row-tile grid ("parallel" axis, constant weight index_maps) — but keep one
    # shared NxN GAT softmax per forward (attention crosses titles, per the module).

    kernel = functools.partial(news_encoder_kernel, batch=B, seq=S, embed_dim=E)
    full = lambda i: (0, 0)  # single grid step, whole-array blocks
    return pl.pallas_call(
        kernel,
        out_shape=jax.ShapeDtypeStruct((B, E), f32),
        grid=(1,),
        in_specs=[
            pl.BlockSpec((N, 1), full),        # title ids, column layout
            pl.BlockSpec((V, E + 2), full),    # [embedding | emb@W@a1 | emb@W@a2]
            pl.BlockSpec((E + 2, E), full),    # GAT weight W (zero-padded rows)
            pl.BlockSpec((E, Q), full),        # additive-attn linear weight (x @ Wa)
            pl.BlockSpec((1, Q), full),        # additive-attn linear bias
            pl.BlockSpec((1, Q), full),        # additive-attn query vector (row)
        ],
        out_specs=pl.BlockSpec((B, E), full),
        compiler_params=pltpu.CompilerParams(
            dimension_semantics=("arbitrary",)),
    )(tid_col, emb_ext, W_pad, Wa_c, ba2d, qv_row)


def reference(title, embedding, W, a, Wa, ba, qv):
    """Plain-JAX replica of the torch forward (eval mode)."""
    B, S = title.shape
    E = embedding.shape[1]
    x = embedding[title].reshape(B * S, E)
    Wh = x @ W
    e = Wh @ a[:E, :] + (Wh @ a[E:, :]).T
    e = jnp.where(e > 0, e, LEAKY_ALPHA * e)
    att = jax.nn.softmax(e, axis=1)
    hp = att @ Wh
    gat = jnp.where(hp > 0, hp, jnp.exp(jnp.minimum(hp, 0.0)) - 1.0)
    gat = gat.reshape(B, S, E)
    temp = jnp.tanh(gat @ Wa + ba.reshape(1, 1, -1))
    w = jax.nn.softmax(temp @ qv, axis=1)
    return jnp.sum(gat * w, axis=1)


def _xavier(key, shape, gain=1.0):
    fan_in, fan_out = shape[0], shape[1]
    limit = gain * (6.0 / (fan_in + fan_out)) ** 0.5
    return jax.random.uniform(key, shape, minval=-limit, maxval=limit,
                              dtype=jnp.float32)


if __name__ == "__main__":
    # Config-implied small shapes.
    num_words, B, S, E, Q = 50, 2, 8, 32, 16

    key = jax.random.PRNGKey(0)
    k_title, k_emb, k_W, k_a, k_lw, k_lb, k_qv = jax.random.split(key, 7)

    title = jax.random.randint(k_title, (B, S), 0, num_words, dtype=jnp.int32)

    embedding = 0.1 * jax.random.normal(k_emb, (num_words, E), dtype=jnp.float32)
    embedding = embedding.at[0].set(0.0)                  # padding_idx=0

    W = _xavier(k_W, (E, E), gain=1.414)                  # GAT weight
    a = _xavier(k_a, (2 * E, 1), gain=1.414)              # GAT attention vector
    lin_w = _xavier(k_lw, (Q, E))                         # Linear(E -> Q), torch layout
    lin_b = 0.01 * jax.random.normal(k_lb, (Q,), dtype=jnp.float32)
    Wa = lin_w.T                                          # (E, Q) for x @ Wa
    qv = _xavier(k_qv, (Q, 1))                            # additive-attn query

    ref = reference(title, embedding, W, a, Wa, lin_b, qv)

    # f32 MXU path (module semantics; tolerance covers the approximate EUP
    # reciprocals in the two softmax normalizations).
    out = news_encoder(title, embedding, W, a, Wa, lin_b, qv)
    out = jax.block_until_ready(out)
    assert out.shape == (B, E)
    assert jnp.allclose(out, ref, rtol=2e-3, atol=2e-3), "f32 kernel mismatch"

    # bf16 MXU-operand path (f32 accumulation; valid on v5e/v6e/v7x, looser check).
    out_bf16 = news_encoder(title, embedding, W, a, Wa, lin_b, qv,
                            mxu_dtype=jnp.bfloat16)
    out_bf16 = jax.block_until_ready(out_bf16)
    assert jnp.allclose(out_bf16, ref, rtol=5e-2, atol=1e-2), "bf16 kernel mismatch"

    print("KERNEL_OK")
</pallas_src>

<mosaic_0001>
module attributes {stable_mosaic.version = 11 : i64} {
  func.func @news_encoder_kernel(%arg0: i32, %arg1: memref<16x1xi32, #tpu.memory_space<vmem>>, %arg2: memref<50x34xf32, #tpu.memory_space<vmem>>, %arg3: memref<34x32xf32, #tpu.memory_space<vmem>>, %arg4: memref<32x16xf32, #tpu.memory_space<vmem>>, %arg5: memref<1x16xf32, #tpu.memory_space<vmem>>, %arg6: memref<1x16xf32, #tpu.memory_space<vmem>>, %arg7: memref<2x32xf32, #tpu.memory_space<vmem>>) attributes {dimension_semantics = [#tpu.dimension_semantics<arbitrary>], iteration_bounds = array<i64: 1>, scalar_prefetch = 0 : i64, scratch_operands = 0 : i64, tpu.core_type = #tpu.core_type<tc>, window_params = [{pipeline_mode = #tpu.pipeline_mode<synchronous>, transform_indices = @transform_0, window_bounds = array<i64: 16, 1>}, {pipeline_mode = #tpu.pipeline_mode<synchronous>, transform_indices = @transform_1, window_bounds = array<i64: 50, 34>}, {pipeline_mode = #tpu.pipeline_mode<synchronous>, transform_indices = @transform_2, window_bounds = array<i64: 34, 32>}, {pipeline_mode = #tpu.pipeline_mode<synchronous>, transform_indices = @transform_3, window_bounds = array<i64: 32, 16>}, {pipeline_mode = #tpu.pipeline_mode<synchronous>, transform_indices = @transform_4, window_bounds = array<i64: 1, 16>}, {pipeline_mode = #tpu.pipeline_mode<synchronous>, transform_indices = @transform_5, window_bounds = array<i64: 1, 16>}, {pipeline_mode = #tpu.pipeline_mode<synchronous>, transform_indices = @transform_6, window_bounds = array<i64: 2, 32>}]} {
    %0 = tpu.iota {dimensions = array<i32: 1>} : vector<16x50xi32>
    %c0 = arith.constant 0 : index
    %c0_0 = arith.constant 0 : index
    %1 = vector.load %arg1[%c0, %c0_0] : memref<16x1xi32, #tpu.memory_space<vmem>>, vector<16x1xi32>
    %2 = vector.broadcast %1 : vector<16x1xi32> to vector<16x50xi32>
    %3 = arith.cmpi eq, %0, %2 : vector<16x50xi32>
    %cst = arith.constant 1.000000e+00 : f32
    %cst_1 = arith.constant 0.000000e+00 : f32
    %4 = vector.broadcast %cst : f32 to vector<16x50xf32>
    %5 = vector.broadcast %cst_1 : f32 to vector<16x50xf32>
    %6 = arith.select %3, %4, %5 : vector<16x50xi1>, vector<16x50xf32>
    %c0_2 = arith.constant 0 : index
    %c0_3 = arith.constant 0 : index
    %7 = vector.load %arg2[%c0_2, %c0_3] : memref<50x34xf32, #tpu.memory_space<vmem>>, vector<50x34xf32>
    %cst_4 = arith.constant dense<0.000000e+00> : vector<16x34xf32>
    %8 = tpu.matmul %6, %7, %cst_4 {dimension_numbers = #tpu.dot_dimension_numbers<[1], [0], [0], [1], [0, 0, 1, 1], [], []>} : vector<16x50xf32>, vector<50x34xf32>, vector<16x34xf32> -> vector<16x34xf32>
    %9 = vector.extract_strided_slice %8 {offsets = [0, 32], sizes = [16, 1], strides = [1, 1]} : vector<16x34xf32> to vector<16x1xf32>
    %10 = vector.extract_strided_slice %8 {offsets = [0, 33], sizes = [16, 1], strides = [1, 1]} : vector<16x34xf32> to vector<16x1xf32>
    %11 = tpu.iota {dimensions = array<i32: 0>} : vector<16x16xi32>
    %12 = tpu.iota {dimensions = array<i32: 1>} : vector<16x16xi32>
    %13 = arith.cmpi eq, %11, %12 : vector<16x16xi32>
    %cst_5 = arith.constant 0.000000e+00 : f32
    %14 = vector.shape_cast %10 : vector<16x1xf32> to vector<16x1xf32>
    %15 = vector.broadcast %14 : vector<16x1xf32> to vector<16x16xf32>
    %16 = vector.broadcast %cst_5 : f32 to vector<16x16xf32>
    %17 = arith.select %13, %15, %16 : vector<16x16xi1>, vector<16x16xf32>
    %cst_6 = arith.constant dense<0.000000e+00> : vector<16xf32>
    %18 = vector.multi_reduction <add>, %17, %cst_6 [0] : vector<16x16xf32> to vector<16xf32>
    %19 = vector.shape_cast %18 : vector<16xf32> to vector<1x16xf32>
    %20 = vector.broadcast %9 : vector<16x1xf32> to vector<16x16xf32>
    %21 = vector.broadcast %19 : vector<1x16xf32> to vector<16x16xf32>
    %22 = arith.addf %20, %21 : vector<16x16xf32>
    %cst_7 = arith.constant 0.000000e+00 : f32
    %23 = vector.broadcast %cst_7 : f32 to vector<16x16xf32>
    %24 = arith.cmpf ogt, %22, %23 : vector<16x16xf32>
    %cst_8 = arith.constant 2.000000e-01 : f32
    %25 = vector.broadcast %cst_8 : f32 to vector<16x16xf32>
    %26 = arith.mulf %25, %22 : vector<16x16xf32>
    %27 = arith.select %24, %22, %26 : vector<16x16xi1>, vector<16x16xf32>
    %cst_9 = arith.constant dense<0xFF800000> : vector<16xf32>
    %28 = vector.multi_reduction <maximumf>, %27, %cst_9 [1] : vector<16x16xf32> to vector<16xf32>
    %29 = vector.shape_cast %28 : vector<16xf32> to vector<16x1xf32>
    %30 = vector.broadcast %29 : vector<16x1xf32> to vector<16x16xf32>
    %31 = arith.subf %27, %30 : vector<16x16xf32>
    %32 = math.exp %31 : vector<16x16xf32>
    %cst_10 = arith.constant dense<0.000000e+00> : vector<16xf32>
    %33 = vector.multi_reduction <add>, %32, %cst_10 [1] : vector<16x16xf32> to vector<16xf32>
    %34 = vector.shape_cast %33 : vector<16xf32> to vector<16x1xf32>
    %35 = tpu.reciprocal %34 {approx = true} : vector<16x1xf32> -> vector<16x1xf32>
    %36 = vector.broadcast %35 : vector<16x1xf32> to vector<16x16xf32>
    %37 = arith.mulf %32, %36 : vector<16x16xf32>
    %c0_11 = arith.constant 0 : index
    %c0_12 = arith.constant 0 : index
    %38 = vector.load %arg3[%c0_11, %c0_12] : memref<34x32xf32, #tpu.memory_space<vmem>>, vector<34x32xf32>
    %cst_13 = arith.constant dense<0.000000e+00> : vector<16x32xf32>
    %39 = tpu.matmul %8, %38, %cst_13 {dimension_numbers = #tpu.dot_dimension_numbers<[1], [0], [0], [1], [0, 0, 1, 1], [], []>} : vector<16x34xf32>, vector<34x32xf32>, vector<16x32xf32> -> vector<16x32xf32>
    %cst_14 = arith.constant dense<0.000000e+00> : vector<16x32xf32>
    %40 = tpu.matmul %37, %39, %cst_14 {dimension_numbers = #tpu.dot_dimension_numbers<[1], [0], [0], [1], [0, 0, 1, 1], [], []>} : vector<16x16xf32>, vector<16x32xf32>, vector<16x32xf32> -> vector<16x32xf32>
    %cst_15 = arith.constant 0.000000e+00 : f32
    %41 = vector.broadcast %cst_15 : f32 to vector<16x32xf32>
    %42 = arith.cmpf ogt, %40, %41 : vector<16x32xf32>
    %cst_16 = arith.constant 0.000000e+00 : f32
    %43 = vector.broadcast %cst_16 : f32 to vector<16x32xf32>
    %44 = arith.minimumf %40, %43 : vector<16x32xf32>
    %45 = math.exp %44 : vector<16x32xf32>
    %cst_17 = arith.constant 1.000000e+00 : f32
    %46 = vector.broadcast %cst_17 : f32 to vector<16x32xf32>
    %47 = arith.subf %45, %46 : vector<16x32xf32>
    %48 = arith.select %42, %40, %47 : vector<16x32xi1>, vector<16x32xf32>
    %c0_18 = arith.constant 0 : index
    %c0_19 = arith.constant 0 : index
    %49 = vector.load %arg4[%c0_18, %c0_19] : memref<32x16xf32, #tpu.memory_space<vmem>>, vector<32x16xf32>
    %cst_20 = arith.constant dense<0.000000e+00> : vector<16x16xf32>
    %50 = tpu.matmul %48, %49, %cst_20 {dimension_numbers = #tpu.dot_dimension_numbers<[1], [0], [0], [1], [0, 0, 1, 1], [], []>} : vector<16x32xf32>, vector<32x16xf32>, vector<16x16xf32> -> vector<16x16xf32>
    %c0_21 = arith.constant 0 : index
    %c0_22 = arith.constant 0 : index
    %51 = vector.load %arg5[%c0_21, %c0_22] : memref<1x16xf32, #tpu.memory_space<vmem>>, vector<1x16xf32>
    %52 = vector.broadcast %51 : vector<1x16xf32> to vector<16x16xf32>
    %53 = arith.addf %50, %52 : vector<16x16xf32>
    %54 = math.tanh %53 : vector<16x16xf32>
    %55 = vector.shape_cast %48 : vector<16x32xf32> to vector<2x8x32xf32>
    %56 = vector.shape_cast %54 : vector<16x16xf32> to vector<2x8x16xf32>
    %c0_23 = arith.constant 0 : index
    %c0_24 = arith.constant 0 : index
    %57 = vector.load %arg6[%c0_23, %c0_24] : memref<1x16xf32, #tpu.memory_space<vmem>>, vector<1x16xf32>
    %58 = vector.shape_cast %57 : vector<1x16xf32> to vector<1x1x16xf32>
    %59 = vector.broadcast %58 : vector<1x1x16xf32> to vector<2x8x16xf32>
    %60 = arith.mulf %56, %59 : vector<2x8x16xf32>
    %cst_25 = arith.constant dense<0.000000e+00> : vector<2x8xf32>
    %61 = vector.multi_reduction <add>, %60, %cst_25 [2] : vector<2x8x16xf32> to vector<2x8xf32>
    %62 = vector.shape_cast %61 : vector<2x8xf32> to vector<2x8x1xf32>
    %cst_26 = arith.constant dense<0xFF800000> : vector<2x1xf32>
    %63 = vector.multi_reduction <maximumf>, %62, %cst_26 [1] : vector<2x8x1xf32> to vector<2x1xf32>
    %64 = vector.shape_cast %63 : vector<2x1xf32> to vector<2x1x1xf32>
    %65 = vector.broadcast %64 : vector<2x1x1xf32> to vector<2x8x1xf32>
    %66 = arith.subf %62, %65 : vector<2x8x1xf32>
    %67 = math.exp %66 : vector<2x8x1xf32>
    %cst_27 = arith.constant dense<0.000000e+00> : vector<2x1xf32>
    %68 = vector.multi_reduction <add>, %67, %cst_27 [1] : vector<2x8x1xf32> to vector<2x1xf32>
    %69 = vector.shape_cast %68 : vector<2x1xf32> to vector<2x1x1xf32>
    %70 = tpu.reciprocal %69 {approx = true} : vector<2x1x1xf32> -> vector<2x1x1xf32>
    %71 = vector.broadcast %70 : vector<2x1x1xf32> to vector<2x8x1xf32>
    %72 = arith.mulf %67, %71 : vector<2x8x1xf32>
    %73 = vector.broadcast %72 : vector<2x8x1xf32> to vector<2x8x32xf32>
    %74 = arith.mulf %73, %55 : vector<2x8x32xf32>
    %cst_28 = arith.constant dense<0.000000e+00> : vector<2x32xf32>
    %75 = vector.multi_reduction <add>, %74, %cst_28 [1] : vector<2x8x32xf32> to vector<2x32xf32>
    %c0_29 = arith.constant 0 : index
    %c0_30 = arith.constant 0 : index
    %76 = vector.load %arg7[%c0_29, %c0_30] : memref<2x32xf32, #tpu.memory_space<vmem>>, vector<2x32xf32>
    tpu.vector_store %arg7[%c0_29, %c0_30], %75 {strides = array<i32>} : memref<2x32xf32, #tpu.memory_space<vmem>>, vector<2x32xf32>,
    return
  }
  func.func @transform_0(%arg0: i32) -> (i32, i32) {
    %c0_i32 = arith.constant 0 : i32
    %c0_i32_0 = arith.constant 0 : i32
    %c0_i32_1 = arith.constant 0 : i32
    return %c0_i32, %c0_i32_0 : i32, i32
  }
  func.func @transform_1(%arg0: i32) -> (i32, i32) {
    %c0_i32 = arith.constant 0 : i32
    %c0_i32_0 = arith.constant 0 : i32
    %c0_i32_1 = arith.constant 0 : i32
    return %c0_i32, %c0_i32_0 : i32, i32
  }
  func.func @transform_2(%arg0: i32) -> (i32, i32) {
    %c0_i32 = arith.constant 0 : i32
    %c0_i32_0 = arith.constant 0 : i32
    %c0_i32_1 = arith.constant 0 : i32
    return %c0_i32, %c0_i32_0 : i32, i32
  }
  func.func @transform_3(%arg0: i32) -> (i32, i32) {
    %c0_i32 = arith.constant 0 : i32
    %c0_i32_0 = arith.constant 0 : i32
    %c0_i32_1 = arith.constant 0 : i32
    return %c0_i32, %c0_i32_0 : i32, i32
  }
  func.func @transform_4(%arg0: i32) -> (i32, i32) {
    %c0_i32 = arith.constant 0 : i32
    %c0_i32_0 = arith.constant 0 : i32
    %c0_i32_1 = arith.constant 0 : i32
    return %c0_i32, %c0_i32_0 : i32, i32
  }
  func.func @transform_5(%arg0: i32) -> (i32, i32) {
    %c0_i32 = arith.constant 0 : i32
    %c0_i32_0 = arith.constant 0 : i32
    %c0_i32_1 = arith.constant 0 : i32
    return %c0_i32, %c0_i32_0 : i32, i32
  }
  func.func @transform_6(%arg0: i32) -> (i32, i32) {
    %c0_i32 = arith.constant 0 : i32
    %c0_i32_0 = arith.constant 0 : i32
    %c0_i32_1 = arith.constant 0 : i32
    return %c0_i32, %c0_i32_0 : i32, i32
  }
}

</mosaic_0001>

<bundles_post_ra>
// kernel: tpu_custom_call.1
= control target key start
LH: loop header
LB: loop body
LE: loop exit
PB: predicated region body
PF: predicated region fallthrough
CT: control target
= control target key end

     0   :  { %vm52_vm0 = vcmask 1041408   ;;  %v701_v2 = vmov 0   ;;  %s822_s0 = inlined_call_operand.vmem [shape: s32[16,1], index: 0, kind: input, shape index: {}]   ;;  %s823_s1 = inlined_call_operand.vmem [shape: f32[50,34], index: 1, kind: input, shape index: {}]   ;;  %s824_s2 = inlined_call_operand.vmem [shape: f32[34,32], index: 2, kind: input, shape index: {}]   ;;  %s825_s3 = inlined_call_operand.vmem [shape: f32[32,16], index: 3, kind: input, shape index: {}]   ;;  %s826_s4 = inlined_call_operand.vmem [shape: f32[1,16], index: 4, kind: input, shape index: {}]   ;;  %s827_s5 = inlined_call_operand.vmem [shape: f32[1,16], index: 5, kind: input, shape index: {}]   ;;  %s828_s6 = inlined_call_operand.hbm [shape: f32[2,32], index: 6, kind: output, shape index: {}]  }
   0x1   :  { %v26_v0 = vld [vmem:[%s822_s0] sm:$0xff]  ;;  %v44_v1 = vld [vmem:[%s823_s1 + $0x30] sm:$0x3]  ;;  %651 = vset.pattern.permute.xlu0 %v701_v2  ;;  %v43_v3 = vld [vmem:[%s823_s1 + $0x28] sm:$0xff] }
   0x2   :  { %598 = vmatprep.subr.msk.mxu0 %vm52_vm0, %v44_v1  ;;  %29 = vperm.xlu0 %651, %v26_v0   ;;  %v42_v4 = vld [vmem:[%s823_s1 + $0x20] sm:$0xff]  ;;  %v27_v5 = vld [vmem:[%s822_s0 + $0x8] sm:$0xff] }
   0x3   :  { %599 = vmatpush3.msk.msra.mxu0 %vm52_vm0, %v44_v1 }
   0x4   :  { %600 = vmatprep.subr.mxu0 %v43_v3 }
   0x5   :  { %11 = vsyncpa [#allocation3], 0  ;;  %601 = vmatpush3.msra.mxu0 %v43_v3  ;;  %v41_v6 = vld [vmem:[%s823_s1 + $0x18] sm:$0xff]  ;;  %v200_v7 = vld [vmem:[%s824_s2 + $0x20] sm:$0x3]  ;;  %v24_v13 = vlaneseq  ;;  %vm45_vm1 = vcmask 408576  }
   0x6   :  { %602 = vmatprep.subr.mxu0 %v42_v4  ;;  %615 = vmatprep.subr.msk.mxu1 %vm52_vm0, %v200_v7  ;;  %v199_v8 = vld [vmem:[%s824_s2 + $0x18] sm:$0xff]  ;;  %v40_v9 = vld [vmem:[%s823_s1 + $0x10] sm:$0xff]  ;;  %v39_v11 = vld [vmem:[%s823_s1 + $0x8] sm:$0xff]  ;;  %v702_v16 = vmov 0.0   ;;  %v703_v22 = vmov 33   ;;  %v704_v23 = vmov 32  }
   0x7   :  { %32 = vperm.xlu0 %651, %v27_v5   ;;  %603 = vmatpush3.msra.mxu0 %v42_v4  ;;  %v198_v10 = vld [vmem:[%s824_s2 + $0x10] sm:$0xff]  ;;  %v38_v12 = vld [vmem:[%s823_s1] sm:$0xff]  ;;  %v25_v14 = vand.u32 127, %v24_v13  ;;  %v197_v20 = vld [vmem:[%s824_s2 + $0x8] sm:$0xff]  ;;  %vm201_vm4 = vcmask 277504   ;;  %v132_v26 = vshrl.u32 %v24_v13, 7 }
   0x8   :  { %604 = vmatprep.subr.mxu0 %v41_v6  ;;  %616 = vmatpush3.msk.msra.mxu1 %vm52_vm0, %v200_v7  ;;  %v196_v21 = vld [vmem:[%s824_s2] sm:$0xff]  ;;  %vm148_vm7 = vcmask 130048   ;;  %v380_v5 = vld [vmem:[%s825_s3 + $0x18] sm:$0xff]  ;;  %v378_v7 = vld [vmem:[%s825_s3 + $0x8] sm:$0xff]  ;;  %vm388_vm10 = vcmask 261120   ;;  %vm539_vm13 = vcmask 1041409  }
   0x9   :  { %605 = vmatpush3.msra.mxu0 %v41_v6  ;;  %617 = vmatprep.subr.mxu1 %v199_v8  ;;  %v133_v27 = vadd.s32 8, %v132_v26  ;;  %vm134_vm5 = vcmp.eq.s32.totalorder %v132_v26, %v25_v14  ;;  %v379_v6 = vld [vmem:[%s825_s3 + $0x10] sm:$0xff]  ;;  %v571_v26 = vld [vmem:[%s827_s5] ss:$0 sm:$0xff]  ;;  %vm542_vm14 = vcmask 254976  }
   0xa   :  { %606 = vmatprep.subr.mxu0 %v40_v9  ;;  %618 = vmatpush3.msra.mxu1 %v199_v8  ;;  %v377_v8 = vld [vmem:[%s825_s3] sm:$0xff] }
   0xb   :  { %607 = vmatpush3.msra.mxu0 %v40_v9  ;;  %619 = vmatprep.subr.mxu1 %v198_v10  ;;  %vm135_vm6 = vcmp.eq.s32.totalorder %v133_v27, %v25_v14 }
   0xc   :  { %608 = vmatprep.subr.mxu0 %v39_v11  ;;  %620 = vmatpush3.msra.mxu1 %v198_v10 }
   0xd   :  { %609 = vmatpush3.msra.mxu0 %v39_v11  ;;  %621 = vmatprep.subr.mxu1 %v197_v20 }
   0xe   :  { %610 = vmatprep.subr.mxu0 %v38_v12  ;;  %622 = vmatpush3.msra.mxu1 %v197_v20 }
   0xf   :  { %611 = vmatpush3.msra.mxu0 %v38_v12  ;;  %652 = vset.pattern.permute.xlu1 %v703_v22 }
  0x10   :  { %623 = vmatprep.subr.mxu1 %v196_v21  ;;  %653 = vset.pattern.permute.xlu0 %v704_v23 }
  0x11   :  { %624 = vmatpush3.msra.mxu1 %v196_v21  ;;  %635 = vmatprep.subr.mxu0 %v380_v5  ;;  %v568_v21 = vld [vmem:[%s826_s4] ss:$0 sm:$0xff]  ;;  %s705_s4 = smov [#allocation2]  }
  0x12   :  { %s550_s5 = sshll.u32 %s705_s4, 4  ;;  %s551_s5 = int_to_ptr.vmem [resolvable:$true] %s550_s5 }
  0x13   :  { %s679_s9 = scalar_lea.vmem %s551_s5, 32  ;;  %p684_p1 = scmp.lt.s32.totalorder %s551_s5, %s551_s5 }
  0x14   :  { %p680_p0 = scmp.ne.s32.totalorder %s551_s5, %s679_s9  ;;  %p685_p2 = scmp.lt.s32.totalorder %s679_s9, %s679_s9 }
  0x16   :  { %p686_p3 = por %p685_p2, %p684_p1 }
  0x18   :  { %p687_p4 = pnand %p686_p3, %p680_p0 }
  0x7d   :  { %v30_v15 = vpop.permute.xlu0 %29 }
  0x7e   :  { %vm34_vm2 = vcmp.eq.s32.totalorder %v25_v14, %v30_v15 }
  0x7f   :  { %v36_v17 = vsel %vm34_vm2, 1.0, %v702_v16 }
  0x80   :  { %612 = vmatprep.mubr.msk.f32.mxu0 %vm45_vm1, %v36_v17 }
  0x82   :  { %v33_v18 = vpop.permute.xlu0 %32 }
  0x83   :  { %vm35_vm3 = vcmp.eq.s32.totalorder %v25_v14, %v33_v18 }
  0x84   :  { %v37_v19 = vsel %vm35_vm3, 1.0, %v702_v16 }
  0x85   :  { %613 = vmatmul.mubr.msk.f32.vlgmr.msra.gmra.mxu0 %vm45_vm1, %v37_v19 }
  0x86   :  { %636 = vmatpush3.msra.mxu0 %v380_v5 }
  0x87   :  { %637 = vmatprep.subr.mxu0 %v379_v6 }
  0x88   :  { %638 = vmatpush3.msra.mxu0 %v379_v6 }
  0x89   :  { %639 = vmatprep.subr.mxu0 %v378_v7 }
  0x8a   :  { %640 = vmatpush3.msra.mxu0 %v378_v7 }
  0x8b   :  { %641 = vmatprep.subr.mxu0 %v377_v8 }
  0x8c   :  { %642 = vmatpush3.msra.mxu0 %v377_v8 }
 0x145   :  { %v614_v24 = vpop.f32.mrf.mxu0 }
 0x147   :  { %v122_v25 = vpop.f32.mrf.mxu0 }
 0x148   :  { %159 = vperm.xlu0 %653, %v122_v25   ;;  %138 = vperm.xlu1 %652, %v122_v25  }
 0x149   :  { %625 = vmatprep.mubr.msk.f32.mxu1 %vm201_vm4, %v122_v25 }
 0x14a   :  { %626 = vmatmul.mubr.msk.f32.vlgmr.msra.gmra.mxu1 %vm201_vm4, %v614_v24 }
 0x14c   :  { %143 = vperm.xlu1 %652, %v614_v24  }
 0x150   :  { %654 = vset.pattern.permute.xlu1 %v704_v23 }
 0x151   :  { %163 = vperm.xlu1 %654, %v614_v24  }
 0x1c3   :  { %v139_v28 = vpop.permute.xlu1 %138  ;;  %v160_v41 = vpop.permute.xlu0 %159 }
 0x1c4   :  { %v146_v29 = vsel %vm134_vm5, %v139_v28, 0.0 }
 0x1c5   :  { %v149_v32 = vsel %vm148_vm7, %v146_v29, 0.0 }
 0x1c7   :  { %v144_v30 = vpop.permute.xlu1 %143 }
 0x1c8   :  { %v147_v31 = vsel %vm135_vm6, %v144_v30, 0.0 }
 0x1c9   :  { %v150_v33 = vsel %vm148_vm7, %v147_v31, 0.0 }
 0x1ca   :  { %v151_v34 = vadd.f32 %v150_v33, %v149_v32 }
 0x1cc   :  { %v152_v35 = vrot.slane %v151_v34, 4  ;;  %v164_v42 = vpop.permute.xlu1 %163 }
 0x1ce   :  { %v153_v36 = vadd.f32 %v152_v35, %v151_v34 }
 0x1d0   :  { %v154_v37 = vrot.slane %v153_v36, 2 }
 0x1d2   :  { %v155_v38 = vadd.f32 %v154_v37, %v153_v36 }
 0x1d4   :  { %v156_v39 = vrot.slane %v155_v38, 1 }
 0x1d6   :  { %v157_v40 = vadd.f32 %v156_v39, %v155_v38 }
 0x1d8   :  { %v166_v43 = vadd.f32 %v160_v41, %v157_v40  ;;  %v167_v44 = vadd.f32 %v164_v42, %v157_v40 }
 0x1da   :  { %v171_v45 = vmul.f32 0.2, %v167_v44  ;;  %vm168_vm8 = vcmp.gt.f32.partialorder %v166_v43, 0.0  ;;  %v170_v46 = vmul.f32 0.2, %v166_v43  ;;  %vm169_vm9 = vcmp.gt.f32.partialorder %v167_v44, 0.0 }
 0x1dc   :  { %v172_v47 = vsel %vm168_vm8, %v166_v43, %v170_v46  ;;  %v173_v48 = vsel %vm169_vm9, %v167_v44, %v171_v45 }
 0x1dd   :  { %v174_v49 = vsel %vm148_vm7, %v172_v47, -inf  ;;  %v177_v50 = vsel %vm148_vm7, %v173_v48, -inf }
 0x1de   :  { %175 = vmax.xlane.f32.xlu1 %v174_v49  ;;  %178 = vmax.xlane.f32.xlu0 %v177_v50 }
 0x20a   :  { %v627_v51 = vpop.f32.mrf.mxu1 }
 0x20b   :  { %628 = vmatprep.subr.mxu1 %v627_v51 }
 0x20c   :  { %v275_v52 = vpop.f32.mrf.mxu1  ;;  %629 = vmatpush3.msra.mxu1 %v627_v51 }
 0x20d   :  { %630 = vmatprep.subr.mxu1 %v275_v52 }
 0x20e   :  { %631 = vmatpush3.msra.mxu1 %v275_v52 }
 0x267   :  { %v179_v53 = vpop.xlane.xlu0 %178  ;;  %v176_v54 = vpop.xlane.xlu1 %175 }
 0x268   :  { %v181_v55 = vsub.f32 %v173_v48, %v179_v53  ;;  %v180_v56 = vsub.f32 %v172_v47, %v176_v54 }
 0x26a   :  { %v184_v57 = vmul.f32 1.442695, %v181_v55  ;;  %v182_v58 = vmul.f32 1.442695, %v180_v56 }
 0x26c   :  { %655 = vpow2.f32 %v184_v57 }
 0x26d   :  { %657 = vpow2.f32 %v182_v58 }
 0x279   :  { %v656_v59 = vpop.eup %655 }
 0x27a   :  { %v658_v60 = vpop.eup %657  ;;  %v189_v61 = vsel %vm148_vm7, %v656_v59, 0.0 }
 0x27b   :  { %190 = vadd.xlane.f32.xlu1 %v189_v61  ;;  %v186_v62 = vsel %vm148_vm7, %v658_v60, 0.0 }
 0x27c   :  { %187 = vadd.xlane.f32.xlu0 %v186_v62 }
 0x304   :  { %v191_v63 = vpop.xlane.xlu1 %190 }
 0x305   :  { %v188_v0 = vpop.xlane.xlu0 %187  ;;  %659 = vrcp.f32 %v191_v63 }
 0x306   :  { %661 = vrcp.f32 %v188_v0 }
 0x312   :  { %v660_v1 = vpop.eup %659 }
 0x313   :  { %v662_v2 = vpop.eup %661  ;;  %v195_v3 = vmul.f32 %v660_v1, %v656_v59 }
 0x314   :  { %v194_v4 = vmul.f32 %v662_v2, %v658_v60 }
 0x316   :  { %632 = vmatprep.mubr.msk.f32.mxu1 %vm148_vm7, %v194_v4 }
 0x317   :  { %633 = vmatmul.mubr.msk.f32.vlgmr.msra.gmra.mxu1 %vm148_vm7, %v195_v3 }
 0x3d7   :  { %v634_v9 = vpop.f32.mrf.mxu1 }
 0x3d8   :  { %v368_v10 = vmin.f32 %v634_v9, 0.0  ;;  %vm366_vm12 = vcmp.gt.f32.partialorder %v634_v9, 0.0 }
 0x3d9   :  { %v356_v11 = vpop.f32.mrf.mxu1 }
 0x3da   :  { %v371_v12 = vmul.f32 1.442695, %v368_v10  ;;  %v367_v13 = vmin.f32 %v356_v11, 0.0  ;;  %vm365_vm11 = vcmp.gt.f32.partialorder %v356_v11, 0.0 }
 0x3dc   :  { %663 = vpow2.f32 %v371_v12  ;;  %v369_v14 = vmul.f32 1.442695, %v367_v13 }
 0x3de   :  { %665 = vpow2.f32 %v369_v14 }
 0x3e9   :  { %v664_v15 = vpop.eup %663 }
 0x3ea   :  { %v567_v17 = vadd.f32 -1.0, %v664_v15 }
 0x3eb   :  { %v666_v16 = vpop.eup %665 }
 0x3ec   :  { %v566_v18 = vadd.f32 -1.0, %v666_v16  ;;  %v376_v20 = vsel %vm366_vm12, %v634_v9, %v567_v17 }
 0x3ee   :  { %v375_v19 = vsel %vm365_vm11, %v356_v11, %v566_v18 }
 0x3ef   :  { %643 = vmatprep.mubr.msk.f32.mxu0 %vm388_vm10, %v375_v19 }
 0x3f0   :  { %644 = vmatmul.mubr.msk.f32.vlgmr.msra.gmra.mxu0 %vm388_vm10, %v376_v20 }
 0x4b0   :  { %v645_v22 = vpop.f32.mrf.mxu0 }
 0x4b1   :  { %v467_v23 = vadd.f32 %v645_v22, %v568_v21 }
 0x4b2   :  { %v461_v24 = vpop.f32.mrf.mxu0 }
 0x4b3   :  { %667 = vtanh.f32 %v467_v23  ;;  %v462_v25 = vadd.f32 %v568_v21, %v461_v24 }
 0x4b5   :  { %669 = vtanh.f32 %v462_v25 }
 0x4c0   :  { %v668_v27 = vpop.eup %667 }
 0x4c1   :  { %v480_v28 = vmul.f32 %v668_v27, %v571_v26 }
 0x4c2   :  { %v670_v29 = vpop.eup %669 }
 0x4c3   :  { %v484_v30 = vsel %vm148_vm7, %v480_v28, 0.0  ;;  %v479_v31 = vmul.f32 %v670_v29, %v571_v26 }
 0x4c4   :  { %485 = vadd.xlane.f32.xlu1 %v484_v30 }
 0x4c5   :  { %v481_v32 = vsel %vm148_vm7, %v479_v31, 0.0 }
 0x4c6   :  { %482 = vadd.xlane.f32.xlu0 %v481_v32 }
 0x54d   :  { %v486_v33 = vpop.xlane.xlu1 %485 }
 0x54e   :  { %v493_v34 = vrot.slane %v486_v33, 4 }
 0x54f   :  { %v483_v35 = vpop.xlane.xlu0 %482 }
 0x550   :  { %v494_v36 = vmax.f32 %v486_v33, %v493_v34  ;;  %v487_v37 = vrot.slane %v483_v35, 4 }
 0x552   :  { %v495_v38 = vrot.slane %v494_v36, 2  ;;  %v488_v39 = vmax.f32 %v483_v35, %v487_v37 }
 0x554   :  { %v496_v40 = vmax.f32 %v494_v36, %v495_v38  ;;  %v489_v41 = vrot.slane %v488_v39, 2 }
 0x556   :  { %v497_v42 = vrot.slane %v496_v40, 1  ;;  %v490_v43 = vmax.f32 %v488_v39, %v489_v41 }
 0x558   :  { %v498_v44 = vmax.f32 %v496_v40, %v497_v42  ;;  %v491_v45 = vrot.slane %v490_v43, 1 }
 0x55a   :  { %v500_v46 = vsub.f32 %v486_v33, %v498_v44  ;;  %v492_v47 = vmax.f32 %v490_v43, %v491_v45 }
 0x55c   :  { %v503_v48 = vmul.f32 1.442695, %v500_v46  ;;  %v499_v49 = vsub.f32 %v483_v35, %v492_v47 }
 0x55e   :  { %671 = vpow2.f32 %v503_v48  ;;  %v501_v50 = vmul.f32 1.442695, %v499_v49 }
 0x560   :  { %673 = vpow2.f32 %v501_v50 }
 0x56b   :  { %v672_v51 = vpop.eup %671 }
 0x56c   :  { %v511_v52 = vrot.slane %v672_v51, 4 }
 0x56d   :  { %v674_v53 = vpop.eup %673 }
 0x56e   :  { %v512_v54 = vadd.f32 %v672_v51, %v511_v52  ;;  %v505_v55 = vrot.slane %v674_v53, 4 }
 0x570   :  { %v506_v56 = vadd.f32 %v674_v53, %v505_v55  ;;  %v513_v57 = vrot.slane %v512_v54, 2 }
 0x572   :  { %v507_v58 = vrot.slane %v506_v56, 2  ;;  %v514_v59 = vadd.f32 %v513_v57, %v512_v54 }
 0x574   :  { %v508_v60 = vadd.f32 %v507_v58, %v506_v56  ;;  %v515_v61 = vrot.slane %v514_v59, 1 }
 0x576   :  { %v509_v62 = vrot.slane %v508_v60, 1  ;;  %v516_v63 = vadd.f32 %v515_v61, %v514_v59 }
 0x578   :  { %v510_v0 = vadd.f32 %v509_v62, %v508_v60  ;;  %675 = vrcp.f32 %v516_v63 }
 0x57a   :  { %677 = vrcp.f32 %v510_v0 }
 0x585   :  { %v676_v1 = vpop.eup %675 }
 0x586   :  { %v520_v2 = vmul.f32 %v676_v1, %v672_v51 }
 0x587   :  { %v678_v3 = vpop.eup %677 }
 0x588   :  { %v519_v4 = vmul.f32 %v678_v3, %v674_v53  ;;  %v522_v5 = vmul.f32 %v520_v2, %v376_v20 }
 0x58a   :  { %v521_v6 = vmul.f32 %v519_v4, %v375_v19  ;;  %v530_v7 = vsel %vm388_vm10, %v522_v5, 0.0 }
 0x58b   :  { %v531_v8 = vrot.slane %v530_v7, 4 }
 0x58c   :  { %v523_v9 = vsel %vm388_vm10, %v521_v6, 0.0 }
 0x58d   :  { %v524_v10 = vrot.slane %v523_v9, 4  ;;  %v532_v11 = vadd.f32 %v531_v8, %v530_v7 }
 0x58f   :  { %v525_v12 = vadd.f32 %v524_v10, %v523_v9  ;;  %v533_v13 = vrot.slane %v532_v11, 2 }
 0x591   :  { %v526_v14 = vrot.slane %v525_v12, 2  ;;  %v534_v15 = vadd.f32 %v533_v13, %v532_v11 }
 0x593   :  { %v527_v16 = vadd.f32 %v526_v14, %v525_v12  ;;  %v535_v17 = vrot.slane %v534_v15, 1 }
 0x595   :  { %v528_v18 = vrot.slane %v527_v16, 1  ;;  %v536_v20 = vadd.f32 %v535_v17, %v534_v15 }
 0x597   :  { %v529_v21 = vadd.f32 %v528_v18, %v527_v16 }
 0x599   :  { %v540_v19 = vsel %vm539_vm13, %v536_v20, %v529_v21 }
 0x59a   :  { %543 = vst.msk [vmem:[#allocation2] sm:$0x3] %vm542_vm14, %v540_v19 }
 0x59b   :  { %690 = shalt.err (!%p687_p4)
}
 0x59c   :  { %553 = dma.vmem_to_hbm [thread:$0]  %s551_s5, 32, %s828_s6, [#allocation3]  }
 0x59d   :  { %699 = dma.done.wait [#allocation3], 32  }
 0x59e   :  { %700 = vsyncadd [#allocation3], 4294967264 }
 0x59f   :  { %557 = vsyncpa [#allocation3], 1 }

</bundles_post_ra>
